<compile_context>
chip_gen: v6e
topology: v6e:2x2x1
jax: 0.10.0
libtpu: 0.0.40
codegen_flags: <defaults>
</compile_context>

<pallas_src>
import functools
import math

import jax
import jax.numpy as jnp
from jax import lax
from jax.experimental import pallas as pl
from jax.experimental.pallas import tpu as pltpu

LN_EPS = 1e-5


# --------------------------------------------------------------------------
# Fused Pallas kernel: proj + layer_norm (both towers) + matching head
# --------------------------------------------------------------------------
def fused_head_kernel(qx_ref, qw_ref, qb_ref, rx_ref, rw_ref, rb_ref,
                      out_ref, *, label_smoothing):
    # All operands are f32 at these toy dims.
    # TODO(synk): at production dims (embed_dim>=768, bsz>=512) cast the
    # matmul operands to bf16 (keep preferred_element_type=f32) and tile the
    # projection with a (parallel, parallel, arbitrary) grid sized against
    # the per-generation VMEM budget (64 MiB on v7x vs 128 MiB on v5e/v6e).

    def proj_ln(x, w, b):
        # Linear(embed_dim -> output_dim) followed by parameter-free
        # layer_norm (the free-function layer_norm in the original code).
        y = jnp.dot(x, w, preferred_element_type=jnp.float32) + b
        mean = jnp.mean(y, axis=-1, keepdims=True)
        var = jnp.mean(jnp.square(y - mean), axis=-1, keepdims=True)
        return (y - mean) * lax.rsqrt(var + LN_EPS)

    q = proj_ln(qx_ref[...], qw_ref[...], qb_ref[...])   # (bsz, out_dim)
    r = proj_ln(rx_ref[...], rw_ref[...], rb_ref[...])   # (bsz, out_dim)

    # scores = q @ r.T — contracting dims (1, 1) so no explicit transpose /
    # XLU pass is materialized before the MXU feed.
    scores = lax.dot_general(
        q, r,
        dimension_numbers=(((1,), (1,)), ((), ())),
        preferred_element_type=jnp.float32)               # (bsz, bsz)
    bsz = scores.shape[0]

    row_idx = lax.broadcasted_iota(jnp.int32, (bsz, bsz), 0)
    col_idx = lax.broadcasted_iota(jnp.int32, (bsz, bsz), 1)

    # pred = first argmax index per row (matches torch.max tie-break on CPU)
    row_max = jnp.max(scores, axis=-1, keepdims=True)
    masked_idx = jnp.where(scores == row_max, col_idx, bsz)
    pred = jnp.min(masked_idx, axis=-1, keepdims=True)             # (bsz, 1)
    gold = lax.broadcasted_iota(jnp.int32, (bsz, 1), 0)
    acc = jnp.sum((pred == gold).astype(jnp.float32),
                  keepdims=True) / bsz                             # (1, 1)

    # log_softmax over the last axis (exp/log stay on the EUP slot).
    lse = row_max + jnp.log(jnp.sum(jnp.exp(scores - row_max),
                                    axis=-1, keepdims=True))
    lprobs = scores - lse

    # label_smoothed_nll_loss(log_probs, gold=arange(bsz), eps, sum=True)
    diag_sum = jnp.sum(jnp.where(row_idx == col_idx, lprobs, 0.0),
                       keepdims=True)                              # (1, 1)
    nll_loss = -diag_sum
    smooth_loss = -jnp.sum(lprobs, keepdims=True)                  # (1, 1)
    # TODO(synk): eps_i uses eps / num_classes (== bsz) as in the in-file
    # reference; some fairseq variants use eps / (num_classes - 1).
    eps_i = label_smoothing / bsz
    loss = ((1.0 - label_smoothing) * nll_loss
            + eps_i * smooth_loss) / bsz                           # (1, 1)

    # Pack both scalars into a single lane-dense (8, 128) tile:
    # out[0, 0] = loss, out[0, 1] = acc, rest zero.  One unmasked full-vreg
    # store + one output DMA.
    lane = lax.broadcasted_iota(jnp.int32, out_ref.shape, 1)
    out_ref[...] = jnp.where(lane == 0, loss,
                             jnp.where(lane == 1, acc, 0.0))


def fused_matching_head(q_pooled, q_w, q_b, r_pooled, r_w, r_b,
                        label_smoothing=0.0):
    out_dim = q_w.shape[1]
    out = pl.pallas_call(
        functools.partial(fused_head_kernel,
                          label_smoothing=float(label_smoothing)),
        out_shape=jax.ShapeDtypeStruct((8, 128), jnp.float32),
        in_specs=[pl.BlockSpec(memory_space=pltpu.MemorySpace.VMEM)] * 6,
        out_specs=pl.BlockSpec(memory_space=pltpu.MemorySpace.VMEM),
    )(q_pooled, q_w, q_b.reshape(1, out_dim),
      r_pooled, r_w, r_b.reshape(1, out_dim))
    return out[0, 0], out[0, 1]


# --------------------------------------------------------------------------
# Encoder surrogate (plain-JAX glue)
# --------------------------------------------------------------------------
# TODO(synk): MonoEncoder (transformer stack) source was not provided;
# approximated with embedding + sinusoidal positions + residual ReLU FFN
# blocks.  Shapes/pooling (src[0, :, :]) match the original interface.
def sinusoidal_positions(seq_len, dim):
    pos = jnp.arange(seq_len)[:, None]
    i = jnp.arange(dim)[None, :]
    angle = pos / jnp.power(10000.0, (2 * (i // 2)) / dim)
    return jnp.where(i % 2 == 0, jnp.sin(angle), jnp.cos(angle))


def mono_encoder(enc_params, token_ids):
    emb = enc_params["embed"][token_ids]            # (seq, bsz, D)
    seq, _, D = emb.shape
    x = emb * math.sqrt(D) + sinusoidal_positions(seq, D)[:, None, :]
    for w1, b1, w2, b2 in enc_params["ffn"]:
        h = jnp.maximum(x @ w1 + b1, 0.0)
        x = x + h @ w2 + b2
    mask = token_ids == 0                           # padding mask
    return x, mask


def matching_model_wd_forward(query_params, response_params,
                              eq_orig, wd_orig, response,
                              label_smoothing=0.0):
    """MatchingModel_wd.forward semantics (returns loss, acc).

    ProjEncoder_wd only encodes the wd input (eq is unused except for bsz);
    ProjEncoder encodes the response.  Dropout disabled (eval mode).
    """
    _, bsz = eq_orig.shape
    q_src, _ = mono_encoder(query_params["encoder"], wd_orig)
    r_src, _ = mono_encoder(response_params["encoder"], response)
    q_pooled = q_src[0, :, :]                       # first-token pooling
    r_pooled = r_src[0, :, :]
    assert q_pooled.shape[0] == bsz
    # Single fused Pallas call: proj+LN for both towers, scores, acc, loss.
    return fused_matching_head(
        q_pooled, query_params["proj_w"], query_params["proj_b"],
        r_pooled, response_params["proj_w"], response_params["proj_b"],
        label_smoothing)


# --------------------------------------------------------------------------
# Deterministic parameter init
# --------------------------------------------------------------------------
def init_encoder_params(key, vocab, layers, embed_dim, ff_embed_dim, output_dim):
    keys = jax.random.split(key, 2 + 2 * layers)
    embed = jax.random.normal(keys[0], (vocab, embed_dim), jnp.float32) * 0.02
    ffn = []
    for l in range(layers):
        w1 = jax.random.normal(keys[1 + 2 * l], (embed_dim, ff_embed_dim),
                               jnp.float32) * 0.02
        w2 = jax.random.normal(keys[2 + 2 * l], (ff_embed_dim, embed_dim),
                               jnp.float32) * 0.02
        ffn.append((w1, jnp.zeros((ff_embed_dim,), jnp.float32),
                    w2, jnp.zeros((embed_dim,), jnp.float32)))
    proj_w = jax.random.normal(keys[-1], (embed_dim, output_dim),
                               jnp.float32) * 0.02   # nn.init.normal_(std=0.02)
    proj_b = jnp.zeros((output_dim,), jnp.float32)   # nn.init.constant_(0.0)
    return {"encoder": {"embed": embed, "ffn": ffn},
            "proj_w": proj_w, "proj_b": proj_b}


# --------------------------------------------------------------------------
# Pure-JAX reference for correctness checking
# --------------------------------------------------------------------------
def reference_forward(query_params, response_params, eq, wd, resp, eps):
    def enc_tail(params, ids):
        src, _ = mono_encoder(params["encoder"], ids)
        y = src[0] @ params["proj_w"] + params["proj_b"]
        m = y.mean(-1, keepdims=True)
        v = ((y - m) ** 2).mean(-1, keepdims=True)
        return (y - m) / jnp.sqrt(v + LN_EPS)

    q = enc_tail(query_params, wd)
    r = enc_tail(response_params, resp)
    scores = q @ r.T
    bsz = scores.shape[0]
    gold = jnp.arange(bsz)
    pred = jnp.argmax(scores, axis=-1)
    acc = jnp.mean((pred == gold).astype(jnp.float32))
    lprobs = jax.nn.log_softmax(scores, -1)
    nll = -jnp.sum(lprobs[gold, gold])
    smooth = -jnp.sum(lprobs)
    loss = ((1.0 - eps) * nll + (eps / bsz) * smooth) / bsz
    return loss, acc


# --------------------------------------------------------------------------
if __name__ == "__main__":
    key = jax.random.PRNGKey(0)
    k_eqv, k_wdv, k_tgtv, k_q, k_r, k_ids = jax.random.split(key, 6)

    vocab_eq, vocab_wd, vocab_tgt = 64, 64, 64
    layers, embed_dim, ff_embed_dim, output_dim = 2, 32, 64, 32
    bsz, seq_eq, seq_wd, seq_resp = 8, 8, 10, 12
    label_smoothing = 0.1

    query_params = init_encoder_params(k_q, vocab_wd, layers, embed_dim,
                                       ff_embed_dim, output_dim)
    response_params = init_encoder_params(k_r, vocab_tgt, layers, embed_dim,
                                          ff_embed_dim, output_dim)

    k1, k2, k3 = jax.random.split(k_ids, 3)
    eq_orig = jax.random.randint(k1, (seq_eq, bsz), 0, vocab_eq, jnp.int32)
    wd_orig = jax.random.randint(k2, (seq_wd, bsz), 0, vocab_wd, jnp.int32)
    response = jax.random.randint(k3, (seq_resp, bsz), 0, vocab_tgt, jnp.int32)

    loss, acc = matching_model_wd_forward(query_params, response_params,
                                          eq_orig, wd_orig, response,
                                          label_smoothing)
    loss = jax.block_until_ready(loss)
    acc = jax.block_until_ready(acc)

    ref_loss, ref_acc = reference_forward(query_params, response_params,
                                          eq_orig, wd_orig, response,
                                          label_smoothing)
    assert jnp.allclose(loss, ref_loss, atol=1e-3), (loss, ref_loss)
    assert jnp.allclose(acc, ref_acc, atol=1e-5), (acc, ref_acc)

    print("KERNEL_OK")
</pallas_src>

<mosaic_0001>
module attributes {stable_mosaic.version = 11 : i64} {
  func.func @fused_head_kernel(%arg0: memref<8x32xf32, #tpu.memory_space<vmem>>, %arg1: memref<32x32xf32, #tpu.memory_space<vmem>>, %arg2: memref<1x32xf32, #tpu.memory_space<vmem>>, %arg3: memref<8x32xf32, #tpu.memory_space<vmem>>, %arg4: memref<32x32xf32, #tpu.memory_space<vmem>>, %arg5: memref<1x32xf32, #tpu.memory_space<vmem>>, %arg6: memref<8x128xf32, #tpu.memory_space<vmem>>) attributes {dimension_semantics = [], scalar_prefetch = 0 : i64, scratch_operands = 0 : i64, tpu.core_type = #tpu.core_type<tc>} {
    %c0 = arith.constant 0 : index
    %c0_0 = arith.constant 0 : index
    %0 = vector.load %arg0[%c0, %c0_0] : memref<8x32xf32, #tpu.memory_space<vmem>>, vector<8x32xf32>
    %c0_1 = arith.constant 0 : index
    %c0_2 = arith.constant 0 : index
    %1 = vector.load %arg1[%c0_1, %c0_2] : memref<32x32xf32, #tpu.memory_space<vmem>>, vector<32x32xf32>
    %c0_3 = arith.constant 0 : index
    %c0_4 = arith.constant 0 : index
    %2 = vector.load %arg2[%c0_3, %c0_4] : memref<1x32xf32, #tpu.memory_space<vmem>>, vector<1x32xf32>
    %cst = arith.constant dense<0.000000e+00> : vector<8x32xf32>
    %3 = tpu.matmul %0, %1, %cst {dimension_numbers = #tpu.dot_dimension_numbers<[1], [0], [0], [1], [0, 0, 1, 1], [], []>} : vector<8x32xf32>, vector<32x32xf32>, vector<8x32xf32> -> vector<8x32xf32>
    %4 = vector.broadcast %2 : vector<1x32xf32> to vector<8x32xf32>
    %5 = arith.addf %3, %4 : vector<8x32xf32>
    %cst_5 = arith.constant dense<0.000000e+00> : vector<8xf32>
    %6 = vector.multi_reduction <add>, %5, %cst_5 [1] : vector<8x32xf32> to vector<8xf32>
    %7 = vector.shape_cast %6 : vector<8xf32> to vector<8x1xf32>
    %cst_6 = arith.constant 3.200000e+01 : f32
    %8 = vector.broadcast %cst_6 : f32 to vector<8x1xf32>
    %9 = arith.divf %7, %8 : vector<8x1xf32>
    %10 = vector.broadcast %9 : vector<8x1xf32> to vector<8x32xf32>
    %11 = arith.subf %5, %10 : vector<8x32xf32>
    %12 = arith.mulf %11, %11 : vector<8x32xf32>
    %cst_7 = arith.constant dense<0.000000e+00> : vector<8xf32>
    %13 = vector.multi_reduction <add>, %12, %cst_7 [1] : vector<8x32xf32> to vector<8xf32>
    %14 = vector.shape_cast %13 : vector<8xf32> to vector<8x1xf32>
    %cst_8 = arith.constant 3.200000e+01 : f32
    %15 = vector.broadcast %cst_8 : f32 to vector<8x1xf32>
    %16 = arith.divf %14, %15 : vector<8x1xf32>
    %17 = vector.broadcast %9 : vector<8x1xf32> to vector<8x32xf32>
    %18 = arith.subf %5, %17 : vector<8x32xf32>
    %cst_9 = arith.constant 9.99999974E-6 : f32
    %19 = vector.broadcast %cst_9 : f32 to vector<8x1xf32>
    %20 = arith.addf %16, %19 : vector<8x1xf32>
    %21 = math.rsqrt %20 : vector<8x1xf32>
    %22 = vector.broadcast %21 : vector<8x1xf32> to vector<8x32xf32>
    %23 = arith.mulf %18, %22 : vector<8x32xf32>
    %c0_10 = arith.constant 0 : index
    %c0_11 = arith.constant 0 : index
    %24 = vector.load %arg3[%c0_10, %c0_11] : memref<8x32xf32, #tpu.memory_space<vmem>>, vector<8x32xf32>
    %c0_12 = arith.constant 0 : index
    %c0_13 = arith.constant 0 : index
    %25 = vector.load %arg4[%c0_12, %c0_13] : memref<32x32xf32, #tpu.memory_space<vmem>>, vector<32x32xf32>
    %c0_14 = arith.constant 0 : index
    %c0_15 = arith.constant 0 : index
    %26 = vector.load %arg5[%c0_14, %c0_15] : memref<1x32xf32, #tpu.memory_space<vmem>>, vector<1x32xf32>
    %cst_16 = arith.constant dense<0.000000e+00> : vector<8x32xf32>
    %27 = tpu.matmul %24, %25, %cst_16 {dimension_numbers = #tpu.dot_dimension_numbers<[1], [0], [0], [1], [0, 0, 1, 1], [], []>} : vector<8x32xf32>, vector<32x32xf32>, vector<8x32xf32> -> vector<8x32xf32>
    %28 = vector.broadcast %26 : vector<1x32xf32> to vector<8x32xf32>
    %29 = arith.addf %27, %28 : vector<8x32xf32>
    %cst_17 = arith.constant dense<0.000000e+00> : vector<8xf32>
    %30 = vector.multi_reduction <add>, %29, %cst_17 [1] : vector<8x32xf32> to vector<8xf32>
    %31 = vector.shape_cast %30 : vector<8xf32> to vector<8x1xf32>
    %cst_18 = arith.constant 3.200000e+01 : f32
    %32 = vector.broadcast %cst_18 : f32 to vector<8x1xf32>
    %33 = arith.divf %31, %32 : vector<8x1xf32>
    %34 = vector.broadcast %33 : vector<8x1xf32> to vector<8x32xf32>
    %35 = arith.subf %29, %34 : vector<8x32xf32>
    %36 = arith.mulf %35, %35 : vector<8x32xf32>
    %cst_19 = arith.constant dense<0.000000e+00> : vector<8xf32>
    %37 = vector.multi_reduction <add>, %36, %cst_19 [1] : vector<8x32xf32> to vector<8xf32>
    %38 = vector.shape_cast %37 : vector<8xf32> to vector<8x1xf32>
    %cst_20 = arith.constant 3.200000e+01 : f32
    %39 = vector.broadcast %cst_20 : f32 to vector<8x1xf32>
    %40 = arith.divf %38, %39 : vector<8x1xf32>
    %41 = vector.broadcast %33 : vector<8x1xf32> to vector<8x32xf32>
    %42 = arith.subf %29, %41 : vector<8x32xf32>
    %cst_21 = arith.constant 9.99999974E-6 : f32
    %43 = vector.broadcast %cst_21 : f32 to vector<8x1xf32>
    %44 = arith.addf %40, %43 : vector<8x1xf32>
    %45 = math.rsqrt %44 : vector<8x1xf32>
    %46 = vector.broadcast %45 : vector<8x1xf32> to vector<8x32xf32>
    %47 = arith.mulf %42, %46 : vector<8x32xf32>
    %cst_22 = arith.constant dense<0.000000e+00> : vector<8x8xf32>
    %48 = tpu.matmul %23, %47, %cst_22 {dimension_numbers = #tpu.dot_dimension_numbers<[1], [1], [0], [0], [0, 0, 1, 0], [], []>} : vector<8x32xf32>, vector<8x32xf32>, vector<8x8xf32> -> vector<8x8xf32>
    %49 = tpu.iota {dimensions = array<i32: 0>} : vector<8x8xi32>
    %50 = tpu.iota {dimensions = array<i32: 1>} : vector<8x8xi32>
    %cst_23 = arith.constant dense<0xFF800000> : vector<8xf32>
    %51 = vector.multi_reduction <maximumf>, %48, %cst_23 [1] : vector<8x8xf32> to vector<8xf32>
    %52 = vector.shape_cast %51 : vector<8xf32> to vector<8x1xf32>
    %53 = vector.broadcast %52 : vector<8x1xf32> to vector<8x8xf32>
    %54 = arith.cmpf oeq, %48, %53 : vector<8x8xf32>
    %c8_i32 = arith.constant 8 : i32
    %55 = vector.broadcast %c8_i32 : i32 to vector<8x8xi32>
    %56 = arith.select %54, %50, %55 : vector<8x8xi1>, vector<8x8xi32>
    %cst_24 = arith.constant dense<2147483647> : vector<8xi32>
    %57 = vector.multi_reduction <minsi>, %56, %cst_24 [1] : vector<8x8xi32> to vector<8xi32>
    %58 = vector.shape_cast %57 : vector<8xi32> to vector<8x1xi32>
    %59 = tpu.iota {dimensions = array<i32: 0>} : vector<8x1xi32>
    %60 = arith.cmpi eq, %58, %59 : vector<8x1xi32>
    %61 = arith.extui %60 : vector<8x1xi1> to vector<8x1xi32>
    %62 = arith.sitofp %61 : vector<8x1xi32> to vector<8x1xf32>
    %63 = vector.shape_cast %62 : vector<8x1xf32> to vector<1x8x1xf32>
    %cst_25 = arith.constant dense<0.000000e+00> : vector<1xf32>
    %64 = vector.multi_reduction <add>, %63, %cst_25 [1, 2] : vector<1x8x1xf32> to vector<1xf32>
    %65 = vector.shape_cast %64 : vector<1xf32> to vector<1x1x1xf32>
    %66 = vector.extract %65[0, 0, 0] : f32 from vector<1x1x1xf32>
    %67 = vector.broadcast %66 : f32 to vector<1x1xf32>
    %cst_26 = arith.constant 8.000000e+00 : f32
    %68 = vector.broadcast %cst_26 : f32 to vector<1x1xf32>
    %69 = arith.divf %67, %68 : vector<1x1xf32>
    %70 = vector.broadcast %52 : vector<8x1xf32> to vector<8x8xf32>
    %71 = arith.subf %48, %70 : vector<8x8xf32>
    %72 = math.exp %71 : vector<8x8xf32>
    %cst_27 = arith.constant dense<0.000000e+00> : vector<8xf32>
    %73 = vector.multi_reduction <add>, %72, %cst_27 [1] : vector<8x8xf32> to vector<8xf32>
    %74 = vector.shape_cast %73 : vector<8xf32> to vector<8x1xf32>
    %75 = math.log %74 : vector<8x1xf32>
    %76 = arith.addf %52, %75 : vector<8x1xf32>
    %77 = vector.broadcast %76 : vector<8x1xf32> to vector<8x8xf32>
    %78 = arith.subf %48, %77 : vector<8x8xf32>
    %79 = arith.cmpi eq, %49, %50 : vector<8x8xi32>
    %cst_28 = arith.constant 0.000000e+00 : f32
    %80 = vector.broadcast %cst_28 : f32 to vector<8x8xf32>
    %81 = arith.select %79, %78, %80 : vector<8x8xi1>, vector<8x8xf32>
    %82 = vector.shape_cast %81 : vector<8x8xf32> to vector<1x8x8xf32>
    %cst_29 = arith.constant dense<0.000000e+00> : vector<1xf32>
    %83 = vector.multi_reduction <add>, %82, %cst_29 [1, 2] : vector<1x8x8xf32> to vector<1xf32>
    %84 = vector.shape_cast %83 : vector<1xf32> to vector<1x1x1xf32>
    %85 = vector.extract %84[0, 0, 0] : f32 from vector<1x1x1xf32>
    %86 = vector.broadcast %85 : f32 to vector<1x1xf32>
    %cst_30 = arith.constant 0.000000e+00 : f32
    %87 = vector.broadcast %cst_30 : f32 to vector<1x1xf32>
    %88 = arith.subf %87, %86 : vector<1x1xf32>
    %89 = vector.shape_cast %78 : vector<8x8xf32> to vector<1x8x8xf32>
    %cst_31 = arith.constant dense<0.000000e+00> : vector<1xf32>
    %90 = vector.multi_reduction <add>, %89, %cst_31 [1, 2] : vector<1x8x8xf32> to vector<1xf32>
    %91 = vector.shape_cast %90 : vector<1xf32> to vector<1x1x1xf32>
    %92 = vector.extract %91[0, 0, 0] : f32 from vector<1x1x1xf32>
    %93 = vector.broadcast %92 : f32 to vector<1x1xf32>
    %cst_32 = arith.constant 0.000000e+00 : f32
    %94 = vector.broadcast %cst_32 : f32 to vector<1x1xf32>
    %95 = arith.subf %94, %93 : vector<1x1xf32>
    %cst_33 = arith.constant 0.899999976 : f32
    %96 = vector.broadcast %cst_33 : f32 to vector<1x1xf32>
    %97 = arith.mulf %96, %88 : vector<1x1xf32>
    %cst_34 = arith.constant 1.250000e-02 : f32
    %98 = vector.broadcast %cst_34 : f32 to vector<1x1xf32>
    %99 = arith.mulf %98, %95 : vector<1x1xf32>
    %100 = arith.addf %97, %99 : vector<1x1xf32>
    %cst_35 = arith.constant 8.000000e+00 : f32
    %101 = vector.broadcast %cst_35 : f32 to vector<1x1xf32>
    %102 = arith.divf %100, %101 : vector<1x1xf32>
    %103 = tpu.iota {dimensions = array<i32: 1>} : vector<8x128xi32>
    %c0_i32 = arith.constant 0 : i32
    %104 = vector.broadcast %c0_i32 : i32 to vector<8x128xi32>
    %105 = arith.cmpi eq, %103, %104 : vector<8x128xi32>
    %c1_i32 = arith.constant 1 : i32
    %106 = vector.broadcast %c1_i32 : i32 to vector<8x128xi32>
    %107 = arith.cmpi eq, %103, %106 : vector<8x128xi32>
    %cst_36 = arith.constant 0.000000e+00 : f32
    %108 = vector.shape_cast %69 : vector<1x1xf32> to vector<1x1xf32>
    %109 = vector.broadcast %108 : vector<1x1xf32> to vector<8x128xf32>
    %110 = vector.broadcast %cst_36 : f32 to vector<8x128xf32>
    %111 = arith.select %107, %109, %110 : vector<8x128xi1>, vector<8x128xf32>
    %112 = vector.shape_cast %102 : vector<1x1xf32> to vector<1x1xf32>
    %113 = vector.broadcast %112 : vector<1x1xf32> to vector<8x128xf32>
    %114 = arith.select %105, %113, %111 : vector<8x128xi1>, vector<8x128xf32>
    %c0_37 = arith.constant 0 : index
    %c0_38 = arith.constant 0 : index
    %115 = vector.load %arg6[%c0_37, %c0_38] : memref<8x128xf32, #tpu.memory_space<vmem>>, vector<8x128xf32>
    tpu.vector_store %arg6[%c0_37, %c0_38], %114 {strides = array<i32>} : memref<8x128xf32, #tpu.memory_space<vmem>>, vector<8x128xf32>,
    return
  }
}

</mosaic_0001>

<bundles_post_ra>
// kernel: tpu_custom_call.1
= control target key start
LH: loop header
LB: loop body
LE: loop exit
PB: predicated region body
PF: predicated region fallthrough
CT: control target
= control target key end

     0   :  { %11 = vsyncpa [#allocation3], 0  ;;  %s736_s0 = inlined_call_operand.hbm [shape: f32[8,32], index: 0, kind: input, shape index: {}]   ;;  %s737_s1 = inlined_call_operand.hbm [shape: f32[32,32], index: 1, kind: input, shape index: {}]   ;;  %s738_s2 = inlined_call_operand.vmem [shape: f32[1,32], index: 2, kind: input, shape index: {}]   ;;  %s739_s3 = inlined_call_operand.hbm [shape: f32[8,32], index: 3, kind: input, shape index: {}]   ;;  %s740_s4 = inlined_call_operand.hbm [shape: f32[32,32], index: 4, kind: input, shape index: {}]   ;;  %s741_s5 = inlined_call_operand.vmem [shape: f32[1,32], index: 5, kind: input, shape index: {}]   ;;  %s742_s6 = inlined_call_operand.hbm [shape: f32[8,128], index: 6, kind: output, shape index: {}]  }
   0x1   :  { %12 = vsyncpa [#allocation6], 0 }
   0x2   :  { %13 = vsyncpa [#allocation9], 0 }
   0x3   :  { %14 = vsyncpa [#allocation4], 0  ;;  %s630_s21 = smov [#allocation5]  }
   0x4   :  { %s30_s22 = sshll.u32 %s630_s21, 4  ;;  %s31_s22 = int_to_ptr.vmem [resolvable:$true] %s30_s22 }
   0x5   :  { %s530_s23 = scalar_lea.vmem %s31_s22, 512  ;;  %p535_p1 = scmp.lt.s32.totalorder %s31_s22, %s31_s22 }
   0x6   :  { %p531_p0 = scmp.ne.s32.totalorder %s31_s22, %s530_s23  ;;  %p536_p2 = scmp.lt.s32.totalorder %s530_s23, %s530_s23 }
   0x8   :  { %p537_p3 = por %p536_p2, %p535_p1 }
   0xa   :  { %p538_p4 = pnand %p537_p3, %p531_p0 }
   0xc   :  { %541 = shalt.err (!%p538_p4)
}
   0xd   :  { %s631_s24 = smov 128   ;;  %s632_s25 = smov 8  }
   0xe   :  { %36 = dma.hbm_to_vmem [thread:$0]  %s737_s1, 512, %s31_s22, [#allocation6], %s631_s24, %s631_s24, %s632_s25  }
   0xf   :  { %s633_s28 = smov [#allocation2]   ;;  %s634_s30 = smov [#allocation7]  }
  0x10   :  { %s21_s29 = sshll.u32 %s633_s28, 4  ;;  %s45_s7 = sshll.u32 %s634_s30, 4  ;;  %s22_s29 = int_to_ptr.vmem [resolvable:$true] %s21_s29  ;;  %s46_s7 = int_to_ptr.vmem [resolvable:$true] %s45_s7 }
  0x11   :  { %s550_s8 = scalar_lea.vmem %s22_s29, 128  ;;  %p555_p6 = scmp.lt.s32.totalorder %s22_s29, %s22_s29 }
  0x12   :  { %p551_p5 = scmp.ne.s32.totalorder %s22_s29, %s550_s8  ;;  %p556_p7 = scmp.lt.s32.totalorder %s550_s8, %s550_s8 }
  0x14   :  { %p557_p8 = por %p556_p7, %p555_p6 }
  0x16   :  { %p558_p9 = pnand %p557_p8, %p551_p5 }
  0x18   :  { %561 = shalt.err (!%p558_p9)
}
  0x19   :  { %24 = dma.hbm_to_vmem [thread:$0]  %s736_s0, 128, %s22_s29, [#allocation3]  }
  0x1a   :  { %s570_s11 = scalar_lea.vmem %s46_s7, 128  ;;  %p575_p11 = scmp.lt.s32.totalorder %s46_s7, %s46_s7 }
  0x1b   :  { %p571_p10 = scmp.ne.s32.totalorder %s46_s7, %s570_s11  ;;  %p576_p12 = scmp.lt.s32.totalorder %s570_s11, %s570_s11 }
  0x1d   :  { %p577_p13 = por %p576_p12, %p575_p11 }
  0x1f   :  { %p578_p0 = pnand %p577_p13, %p571_p10 }
  0x21   :  { %581 = shalt.err (!%p578_p0)
}
  0x22   :  { %48 = dma.hbm_to_vmem [thread:$0]  %s739_s3, 128, %s46_s7, [#allocation6]  }
  0x23   :  { %s635_s13 = smov [#allocation8]  }
  0x24   :  { %s54_s14 = sshll.u32 %s635_s13, 4  ;;  %s55_s14 = int_to_ptr.vmem [resolvable:$true] %s54_s14 }
  0x25   :  { %s590_s15 = scalar_lea.vmem %s55_s14, 512  ;;  %p595_p2 = scmp.lt.s32.totalorder %s55_s14, %s55_s14 }
  0x26   :  { %p591_p1 = scmp.ne.s32.totalorder %s55_s14, %s590_s15  ;;  %p596_p3 = scmp.lt.s32.totalorder %s590_s15, %s590_s15 }
  0x28   :  { %p597_p4 = por %p596_p3, %p595_p2 }
  0x2a   :  { %p598_p5 = pnand %p597_p4, %p591_p1 }
  0x2c   :  { %601 = shalt.err (!%p598_p5)
}
  0x2d   :  { %60 = dma.hbm_to_vmem [thread:$0]  %s740_s4, 512, %s55_s14, [#allocation9], %s631_s24, %s631_s24, %s632_s25  }
  0x2e   :  { %622 = dma.done.wait [#allocation3], 128  }
  0x2f   :  { %623 = vsyncadd [#allocation3], 4294967168 }
  0x30   :  { %624 = dma.done.wait [#allocation6], 640  }
  0x31   :  { %625 = vsyncadd [#allocation6], 4294966656 }
  0x32   :  { %626 = dma.done.wait [#allocation9], 512  }
  0x33   :  { %627 = vsyncadd [#allocation9], 4294966784  ;;  %v636_v0 = vmov 0.0   ;;  %vm637_vm0 = vmmov 0   ;;  %v179_v1 = vld [vmem:[#allocation8 + $0x18] sm:$0xff]  ;;  %v79_v2 = vld [vmem:[#allocation5 + $0x18] sm:$0xff]  ;;  %v349_v44 = vlaneseq }
  0x34   :  { %483 = vmatprep.subr.mxu1 %v636_v0  ;;  %472 = vmatprep.subr.mxu0 %v636_v0  ;;  %v178_v3 = vld [vmem:[#allocation8 + $0x10] sm:$0xff]  ;;  %v78_v4 = vld [vmem:[#allocation5 + $0x10] sm:$0xff]  ;;  %v77_v6 = vld [vmem:[#allocation5 + $0x8] sm:$0xff]  ;;  %vm87_vm1 = vcmask 261120   ;;  %vm353_vm2 = vcmask 64512   ;;  %vm377_vm6 = vcmask 7168  }
  0x35   :  { %491 = vmatprep.mubr.msk.f32.mxu1 %vm637_vm0, %v636_v0  ;;  %480 = vmatprep.mubr.msk.f32.mxu0 %vm637_vm0, %v636_v0  ;;  %v177_v5 = vld [vmem:[#allocation8 + $0x8] sm:$0xff]  ;;  %v176_v7 = vld [vmem:[#allocation8] sm:$0xff]  ;;  %v76_v8 = vld [vmem:[#allocation5] sm:$0xff]  ;;  %v722_v45 = vand.u32 127, %v349_v44  ;;  %v350_v61 = vshrl.u32 %v349_v44, 7  ;;  %s638_s20 = smov [#allocation10]  }
  0x36   :  { %484 = vmatpush3.msra.mxu1 %v179_v1  ;;  %473 = vmatpush3.msra.mxu0 %v79_v2  ;;  %v175_v9 = vld [vmem:[#allocation7] sm:$0xff]  ;;  %v75_v10 = vld [vmem:[#allocation2] sm:$0xff]  ;;  %s442_s21 = sshll.u32 %s638_s20, 4  ;;  %s443_s21 = int_to_ptr.vmem [resolvable:$true] %s442_s21 }
  0x37   :  { %485 = vmatprep.subr.mxu1 %v636_v0  ;;  %474 = vmatprep.subr.mxu0 %v636_v0  ;;  %v455_v11 = vld [vmem:[%s741_s5] ss:$0 sm:$0xff]  ;;  %vm401_vm5 = vcmp.eq.s32.totalorder %v350_v61, %v722_v45  ;;  %vm432_vm8 = vcmp.eq.s32.totalorder %v722_v45, 1  ;;  %vm431_vm9 = vcmp.eq.s32.totalorder %v722_v45, 0  ;;  %s602_s22 = scalar_lea.vmem %s443_s21, 128  ;;  %p607_p7 = scmp.lt.s32.totalorder %s443_s21, %s443_s21 }
  0x38   :  { %486 = vmatpush3.msra.mxu1 %v178_v3  ;;  %475 = vmatpush3.msra.mxu0 %v78_v4  ;;  %v453_v12 = vld [vmem:[%s738_s2] ss:$0 sm:$0xff]  ;;  %p603_p6 = scmp.ne.s32.totalorder %s443_s21, %s602_s22  ;;  %p608_p8 = scmp.lt.s32.totalorder %s602_s22, %s602_s22 }
  0x39   :  { %487 = vmatprep.subr.mxu1 %v636_v0  ;;  %476 = vmatprep.subr.mxu0 %v636_v0 }
  0x3a   :  { %488 = vmatpush3.msra.mxu1 %v177_v5  ;;  %477 = vmatpush3.msra.mxu0 %v77_v6  ;;  %p609_p9 = por %p608_p8, %p607_p7 }
  0x3b   :  { %489 = vmatprep.subr.mxu1 %v636_v0  ;;  %478 = vmatprep.subr.mxu0 %v636_v0 }
  0x3c   :  { %490 = vmatpush3.msra.mxu1 %v176_v7  ;;  %479 = vmatpush3.msra.mxu0 %v76_v8  ;;  %p610_p10 = pnand %p609_p9, %p603_p6 }
  0x3d   :  { %492 = vmatmul.mubr.msk.f32.vlgmr.msra.gmra.mxu1 %vm87_vm1, %v175_v9  ;;  %481 = vmatmul.mubr.msk.f32.vlgmr.msra.gmra.mxu0 %vm87_vm1, %v75_v10 }
  0x3e   :  { %494 = vmatprep.subr.mxu0 %v636_v0  ;;  %496 = vmatprep.mubr.msk.f32.mxu0 %vm637_vm0, %v636_v0 }
  0xfd   :  { %v256_v13 = vpop.f32.mrf.mxu1  ;;  %v157_v14 = vpop.f32.mrf.mxu0 }
  0xfe   :  { %v257_v15 = vadd.f32 %v455_v11, %v256_v13  ;;  %v158_v16 = vadd.f32 %v453_v12, %v157_v14 }
  0xff   :  { %v493_v17 = vpop.f32.mrf.mxu1  ;;  %v482_v18 = vpop.f32.mrf.mxu0 }
 0x100   :  { %v260_v19 = vsel %vm87_vm1, %v257_v15, 0.0  ;;  %v161_v20 = vsel %vm87_vm1, %v158_v16, 0.0 }
 0x101   :  { %261 = vadd.xlane.f32.xlu0 %v260_v19 }
 0x105   :  { %162 = vadd.xlane.f32.xlu0 %v161_v20 }
 0x18a   :  { %v262_v21 = vpop.xlane.xlu0 %261 }
 0x18b   :  { %v263_v22 = vmul.f32 0.03125, %v262_v21 }
 0x18d   :  { %v264_v23 = vsub.f32 %v257_v15, %v263_v22 }
 0x18e   :  { %v163_v24 = vpop.xlane.xlu0 %162 }
 0x18f   :  { %v165_v25 = vmul.f32 0.03125, %v163_v24  ;;  %v265_v26 = vmul.f32 %v264_v23, %v264_v23 }
 0x191   :  { %v166_v27 = vsub.f32 %v158_v16, %v165_v25  ;;  %v266_v28 = vsel %vm87_vm1, %v265_v26, 0.0 }
 0x192   :  { %267 = vadd.xlane.f32.xlu1 %v266_v28 }
 0x193   :  { %v167_v29 = vmul.f32 %v166_v27, %v166_v27 }
 0x195   :  { %v168_v30 = vsel %vm87_vm1, %v167_v29, 0.0 }
 0x196   :  { %169 = vadd.xlane.f32.xlu1 %v168_v30 }
 0x21b   :  { %v268_v31 = vpop.xlane.xlu1 %267 }
 0x21c   :  { %v269_v32 = vmul.f32 0.03125, %v268_v31 }
 0x21e   :  { %v270_v33 = vadd.f32 1e-05, %v269_v32 }
 0x21f   :  { %v170_v34 = vpop.xlane.xlu1 %169 }
 0x220   :  { %514 = vrsqrt.f32 %v270_v33  ;;  %v171_v35 = vmul.f32 0.03125, %v170_v34 }
 0x222   :  { %v172_v36 = vadd.f32 1e-05, %v171_v35 }
 0x224   :  { %516 = vrsqrt.f32 %v172_v36 }
 0x22d   :  { %v515_v37 = vpop.eup %514 }
 0x22e   :  { %v272_v38 = vmul.f32 %v515_v37, %v264_v23 }
 0x230   :  { %495 = vmatpush3.xpose.msk.msra.mxu0 %vm87_vm1, %v272_v38 }
 0x231   :  { %v517_v39 = vpop.eup %516 }
 0x232   :  { %v174_v40 = vmul.f32 %v517_v39, %v166_v27 }
 0x234   :  { %497 = vmatmul.mubr.msk.f32.vlgmr.msra.gmra.mxu0 %vm87_vm1, %v174_v40 }
 0x2f4   :  { %v345_v41 = vpop.f32.mrf.mxu0 }
 0x2f5   :  { %v354_v42 = vsel %vm353_vm2, %v345_v41, -inf }
 0x2f6   :  { %355 = vmax.xlane.f32.xlu0 %v354_v42  ;;  %v498_v43 = vpop.f32.mrf.mxu0 }
 0x37f   :  { %v356_v46 = vpop.xlane.xlu0 %355 }
 0x380   :  { %vm357_vm3 = vcmp.eq.f32.partialorder %v345_v41, %v356_v46  ;;  %v391_v47 = vsub.f32 %v345_v41, %v356_v46 }
 0x381   :  { %v358_v48 = vsel %vm357_vm3, %v722_v45, 8 }
 0x382   :  { %v392_v49 = vmul.f32 1.442695, %v391_v47  ;;  %v359_v50 = vsel %vm353_vm2, %v358_v48, 2147483647 }
 0x383   :  { %v361_v51 = vshra.s32 %v359_v50, 16  ;;  %v360_v55 = vand.u32 65535, %v359_v50 }
 0x384   :  { %518 = vpow2.f32 %v392_v49 }
 0x385   :  { %v363_v52 = vcvt.s32.f32 %v361_v51  ;;  %v362_v57 = vcvt.s32.f32 %v360_v55 }
 0x387   :  { %364 = vmin.xlane.f32.xlu1 %v363_v52 }
 0x391   :  { %v519_v53 = vpop.eup %518 }
 0x392   :  { %v394_v54 = vsel %vm353_vm2, %v519_v53, 0.0 }
 0x393   :  { %395 = vadd.xlane.f32.xlu0 %v394_v54 }
 0x410   :  { %v365_v56 = vpop.xlane.xlu1 %364 }
 0x411   :  { %vm366_vm4 = vcmp.eq.f32.partialorder %v363_v52, %v365_v56  ;;  %v371_v4 = vcvt.f32.s32 %v365_v56 }
 0x412   :  { %v367_v58 = vsel %vm366_vm4, %v362_v57, inf }
 0x413   :  { %368 = vmin.xlane.f32.xlu1 %v367_v58  ;;  %v372_v6 = vshll.u32 %v371_v4, 16 }
 0x41c   :  { %v396_v59 = vpop.xlane.xlu0 %395 }
 0x41d   :  { %520 = vlog2.f32 %v396_v59 }
 0x42a   :  { %v521_v60 = vpop.eup %520 }
 0x42b   :  { %v398_v62 = vmul.f32 0.6931472, %v521_v60 }
 0x42d   :  { %v399_v63 = vadd.f32 %v398_v62, %v356_v46 }
 0x42f   :  { %v400_v1 = vsub.f32 %v345_v41, %v399_v63 }
 0x431   :  { %v402_v2 = vsel %vm401_vm5, %v400_v1, 0.0  ;;  %v415_v11 = vsel %vm353_vm2, %v400_v1, 0.0 }
 0x432   :  { %v403_v3 = vsel %vm353_vm2, %v402_v2, 0.0 }
 0x433   :  { %404 = vadd.xlane.f32.xlu1 %v403_v3 }
 0x49c   :  { %v369_v5 = vpop.xlane.xlu1 %368 }
 0x49d   :  { %v370_v7 = vcvt.f32.s32 %v369_v5 }
 0x49f   :  { %v373_v8 = vadd.s32 %v372_v6, %v370_v7 }
 0x4a1   :  { %vm374_vm7 = vcmp.eq.s32.totalorder %v373_v8, %v350_v61 }
 0x4a2   :  { %v459_v9 = vsel %vm374_vm7, 1.0, %v636_v0 }
 0x4a3   :  { %v378_v10 = vsel %vm377_vm6, %v459_v9, 0.0 }
 0x4a4   :  { %379 = vadd.xlane.f32.xlu0 %v378_v10 }
 0x4a8   :  { %416 = vadd.xlane.f32.xlu0 %v415_v11 }
 0x4bc   :  { %v405_v12 = vpop.xlane.xlu1 %404 }
 0x4bd   :  { %v406_v13 = vrot.slane %v405_v12, 4 }
 0x4bf   :  { %v407_v14 = vadd.f32 %v406_v13, %v405_v12 }
 0x4c1   :  { %v408_v15 = vrot.slane %v407_v14, 2 }
 0x4c3   :  { %v409_v19 = vadd.f32 %v408_v15, %v407_v14 }
 0x4c5   :  { %v410_v25 = vrot.slane %v409_v19, 1 }
 0x4c7   :  { %v411_v29 = vadd.f32 %v410_v25, %v409_v19 }
 0x52d   :  { %v380_v16 = vpop.xlane.xlu0 %379 }
 0x52e   :  { %v381_v17 = vrot.slane %v380_v16, 4 }
 0x530   :  { %v382_v18 = vadd.f32 %v381_v17, %v380_v16 }
 0x531   :  { %v417_v20 = vpop.xlane.xlu0 %416 }
 0x532   :  { %v383_v21 = vrot.slane %v382_v18, 2  ;;  %v418_v22 = vrot.slane %v417_v20, 4 }
 0x534   :  { %v419_v23 = vadd.f32 %v418_v22, %v417_v20  ;;  %v384_v24 = vadd.f32 %v383_v21, %v382_v18 }
 0x536   :  { %v420_v0 = vrot.slane %v419_v23, 2  ;;  %v385_v26 = vrot.slane %v384_v24, 1 }
 0x538   :  { %v421_v27 = vadd.f32 %v420_v0, %v419_v23  ;;  %v386_v28 = vadd.f32 %v385_v26, %v384_v24 }
 0x53a   :  { %499 = vpush %v386_v28  ;;  %v422_v30 = vrot.slane %v421_v27, 1 }
 0x53b   :  { %501 = vpush %v411_v29 }
 0x53c   :  { %v423_v31 = vadd.f32 %v422_v30, %v421_v27 }
 0x53e   :  { %503 = vpush %v423_v31 }
 0x56b   :  { %s500_s2 = spop %499 }
 0x56c   :  { %s502_s5 = spop %501  ;;  %v388_v35 = vstv %s500_s2 }
 0x56d   :  { %v413_v32 = vstv %s502_s5  ;;  %v390_v39 = vmul.f32 0.125, %v388_v35 }
 0x56e   :  { %v414_v33 = vsub.f32 0.0, %v413_v32 }
 0x56f   :  { %s504_s19 = spop %503  ;;  %v433_v42 = vsel %vm432_vm8, %v390_v39, 0.0 }
 0x570   :  { %v425_v34 = vstv %s504_s19  ;;  %v427_v37 = vmul.f32 0.9, %v414_v33 }
 0x571   :  { %v426_v36 = vsub.f32 0.0, %v425_v34 }
 0x573   :  { %v428_v38 = vmul.f32 0.0125, %v426_v36 }
 0x575   :  { %v429_v40 = vadd.f32 %v428_v38, %v427_v37 }
 0x577   :  { %v430_v41 = vmul.f32 0.125, %v429_v40 }
 0x579   :  { %v434_v43 = vsel %vm431_vm9, %v430_v41, %v433_v42 }
 0x57a   :  { %435 = vst [vmem:[#allocation10] sm:$0xff] %v434_v43 }
 0x57b   :  { %613 = shalt.err (!%p610_p10)
}
 0x57c   :  { %445 = dma.vmem_to_hbm [thread:$0]  %s443_s21, 128, %s742_s6, [#allocation4]  }
 0x57d   :  { %628 = dma.done.wait [#allocation4], 128  }
 0x57e   :  { %629 = vsyncadd [#allocation4], 4294967168 }
 0x57f   :  { %449 = vsyncpa [#allocation3], 1 }
 0x580   :  { %450 = vsyncpa [#allocation6], 1 }
 0x581   :  { %451 = vsyncpa [#allocation9], 1 }
 0x582   :  { %452 = vsyncpa [#allocation4], 1 }

</bundles_post_ra>
